<compile_context>
chip_gen: v5e
topology: v5e:2x2
jax: 0.10.0
libtpu: 0.0.40
codegen_flags: <defaults>
</compile_context>

<pallas_src>
import functools
import math

import jax
import jax.numpy as jnp
from jax.experimental import pallas as pl
from jax.experimental.pallas import tpu as pltpu

NHEAD = 4
LN_EPS = 1e-5


def _layernorm(x, w, b):
    mu = jnp.mean(x, axis=-1, keepdims=True)
    var = jnp.mean((x - mu) ** 2, axis=-1, keepdims=True)
    return (x - mu) * jax.lax.rsqrt(var + LN_EPS) * w + b


def encoder_layer_kernel(x_ref,
                         wq_ref, bq_ref, wk_ref, bk_ref, wv_ref, bv_ref,
                         wo_ref, bo_ref, w1_ref, b1_ref, w2_ref, b2_ref,
                         ln1w_ref, ln1b_ref, ln2w_ref, ln2b_ref,
                         out_ref, y_ref, *, nbatch, nhead):
    """One encoder layer per grid step; residual stream persists in y_ref."""
    l = pl.program_id(0)
    R, E = y_ref.shape                       # R = nbatch * S (lane-dense slab)
    S = R // nbatch
    hd = E // nhead

    @pl.when(l == 0)
    def _():
        y_ref[...] = x_ref[...].astype(jnp.float32)

    y = y_ref[...]                           # (R, E) f32 residual stream
    yb = y.astype(jnp.bfloat16)              # MXU operand

    # ---------- fused full-width Q/K/V projections (scale folded into wq/bq) --
    q = jnp.dot(yb, wq_ref[...], preferred_element_type=jnp.float32) + bq_ref[...]
    k = jnp.dot(yb, wk_ref[...], preferred_element_type=jnp.float32) + bk_ref[...]
    v = jnp.dot(yb, wv_ref[...], preferred_element_type=jnp.float32) + bv_ref[...]

    # ---------- attention core (static nhead=4 loop, softmax in f32) ----------
    ctx_heads = []
    for h in range(nhead):
        cs = slice(h * hd, (h + 1) * hd)
        q3 = q[:, cs].reshape(nbatch, S, hd)
        k3 = k[:, cs].reshape(nbatch, S, hd)
        v3 = v[:, cs].reshape(nbatch, S, hd)
        s = jnp.einsum('nsd,ntd->nst',
                       q3.astype(jnp.bfloat16), k3.astype(jnp.bfloat16),
                       preferred_element_type=jnp.float32)        # (N, S, S)
        s = s - jnp.max(s, axis=-1, keepdims=True)
        p = jnp.exp(s)
        p = p * pl.reciprocal(jnp.sum(p, axis=-1, keepdims=True), approx=True)
        ctx = jnp.einsum('nst,ntd->nsd',
                         p.astype(jnp.bfloat16), v3.astype(jnp.bfloat16),
                         preferred_element_type=jnp.float32)      # (N, S, hd)
        ctx_heads.append(ctx.reshape(R, hd))
    ctx2d = jnp.concatenate(ctx_heads, axis=-1)                   # (R, E)

    # ---------- head merge == single full-width out-projection ----------------
    attn = (jnp.dot(ctx2d.astype(jnp.bfloat16), wo_ref[...],
                    preferred_element_type=jnp.float32) + bo_ref[...])

    # ---------- residual + LayerNorm 1 (post-norm) ----------------------------
    y = _layernorm(y + attn, ln1w_ref[...], ln1b_ref[...])

    # ---------- feed-forward (ReLU) -------------------------------------------
    # TODO(synk): dropout (p=0.1) is identity here (eval-mode semantics only).
    ff = jnp.maximum(
        jnp.dot(y.astype(jnp.bfloat16), w1_ref[...],
                preferred_element_type=jnp.float32) + b1_ref[...], 0.0)
    ff = (jnp.dot(ff.astype(jnp.bfloat16), w2_ref[...],
                  preferred_element_type=jnp.float32) + b2_ref[...])

    # ---------- residual + LayerNorm 2 ----------------------------------------
    y = _layernorm(y + ff, ln2w_ref[...], ln2b_ref[...])
    y_ref[...] = y

    @pl.when(l == pl.num_programs(0) - 1)
    def _():
        out_ref[...] = y.astype(out_ref.dtype)


@jax.jit
def transformer_encoder(x, params):
    """x: (S, N, E), sequence-first (PyTorch batch_first=False).
    Returns output[:, -1, :] of the PyTorch module, shape (S, E)."""
    S, N, E = x.shape
    # Only batch element N-1 contributes to output[:, -1, :]; attention is
    # independent per batch element, so slice before the kernel (no dead work).
    x2d = x[:, N - 1, :]                     # (S, E) lane-dense slab, R = S
    R = S
    L = params["wq"].shape[0]

    weight_keys = ("wq", "bq", "wk", "bk", "wv", "bv", "wo", "bo",
                   "w1", "b1", "w2", "b2", "ln1w", "ln1b", "ln2w", "ln2b")
    weights = tuple(params[k] for k in weight_keys)

    def wspec(p):                            # per-layer block, layer dim squeezed
        a, b = p.shape[1], p.shape[2]
        return pl.BlockSpec((None, a, b), lambda l: (l, 0, 0))

    xspec = pl.BlockSpec((R, E), lambda l: (0, 0))   # resident across layers

    # VMEM budget: double-buffered per-layer weights + resident activations.
    per_layer_bytes = sum(math.prod(w.shape[1:]) * w.dtype.itemsize
                          for w in weights)
    act_bytes = 3 * R * E * 4                # x block + out block + y scratch
    vmem_limit = int(max(16 << 20,
                         min(64 << 20,
                             2 * per_layer_bytes + 4 * act_bytes + (4 << 20))))

    out2d = pl.pallas_call(
        functools.partial(encoder_layer_kernel, nbatch=1, nhead=NHEAD),
        out_shape=jax.ShapeDtypeStruct((R, E), x.dtype),
        grid_spec=pltpu.PrefetchScalarGridSpec(
            num_scalar_prefetch=0,
            grid=(L,),
            in_specs=[xspec] + [wspec(w) for w in weights],
            out_specs=xspec,
            scratch_shapes=[pltpu.VMEM((R, E), jnp.float32)]),
        compiler_params=pltpu.CompilerParams(
            dimension_semantics=("arbitrary",),
            vmem_limit_bytes=vmem_limit),
    )(x2d, *weights)
    return out2d


def init_params(key, num_layers, d_model, hidden_dim, nhead=NHEAD):
    """Deterministic synthetic init (PyTorch-style layouts), converted ONCE to
    kernel-ready layouts: pre-transposed, scale-folded, bf16 matmul weights,
    stacked over layers."""
    E, H = d_model, hidden_dim
    hd = E // nhead
    scale = 1.0 / math.sqrt(hd)

    def u(k, shape, fan_in):
        bound = 1.0 / math.sqrt(fan_in)
        return jax.random.uniform(k, shape, jnp.float32, -bound, bound)

    keys = ("wq", "bq", "wk", "bk", "wv", "bv", "wo", "bo",
            "w1", "b1", "w2", "b2", "ln1w", "ln1b", "ln2w", "ln2b")
    acc = {k: [] for k in keys}

    for _ in range(num_layers):
        key, *ks = jax.random.split(key, 9)
        wqkv = u(ks[0], (3 * E, E), E)       # PyTorch in_proj_weight layout
        bqkv = u(ks[1], (3 * E,), E)
        wo = u(ks[2], (E, E), E)
        bo = u(ks[3], (E,), E)
        w1 = u(ks[4], (H, E), E)
        b1 = u(ks[5], (H,), E)
        w2 = u(ks[6], (E, H), H)
        b2 = u(ks[7], (E,), H)

        acc["wq"].append((wqkv[:E].T * scale).astype(jnp.bfloat16))   # (E, E)
        acc["wk"].append(wqkv[E:2 * E].T.astype(jnp.bfloat16))
        acc["wv"].append(wqkv[2 * E:].T.astype(jnp.bfloat16))
        acc["bq"].append((bqkv[:E] * scale).reshape(1, E))
        acc["bk"].append(bqkv[E:2 * E].reshape(1, E))
        acc["bv"].append(bqkv[2 * E:].reshape(1, E))
        acc["wo"].append(wo.T.astype(jnp.bfloat16))                   # (E, E)
        acc["bo"].append(bo.reshape(1, E))
        acc["w1"].append(w1.T.astype(jnp.bfloat16))                   # (E, H)
        acc["b1"].append(b1.reshape(1, H))
        acc["w2"].append(w2.T.astype(jnp.bfloat16))                   # (H, E)
        acc["b2"].append(b2.reshape(1, E))
        acc["ln1w"].append(jnp.ones((1, E), jnp.float32))
        acc["ln1b"].append(jnp.zeros((1, E), jnp.float32))
        acc["ln2w"].append(jnp.ones((1, E), jnp.float32))
        acc["ln2b"].append(jnp.zeros((1, E), jnp.float32))

    return {k: jnp.stack(v) for k, v in acc.items()}   # leading layer axis


if __name__ == "__main__":
    S, N, E, H, L = 8, 2, 32, 64, 2    # seq, batch, d_model, dim_feedforward, layers
    key = jax.random.PRNGKey(0)
    kx, kp = jax.random.split(key)
    x = jax.random.normal(kx, (S, N, E), jnp.float32)
    params = init_params(kp, L, E, H)

    out = transformer_encoder(x, params)
    jax.block_until_ready(out)
    assert out.shape == (S, E), out.shape
    assert bool(jnp.all(jnp.isfinite(out)))
    print("KERNEL_OK")
</pallas_src>

<mosaic_0001>
module attributes {stable_mosaic.version = 11 : i64} {
  func.func @encoder_layer_kernel(%arg0: i32, %arg1: memref<8x32xf32, #tpu.memory_space<vmem>>, %arg2: memref<1x32x32xbf16, #tpu.memory_space<vmem>>, %arg3: memref<1x1x32xf32, #tpu.memory_space<vmem>>, %arg4: memref<1x32x32xbf16, #tpu.memory_space<vmem>>, %arg5: memref<1x1x32xf32, #tpu.memory_space<vmem>>, %arg6: memref<1x32x32xbf16, #tpu.memory_space<vmem>>, %arg7: memref<1x1x32xf32, #tpu.memory_space<vmem>>, %arg8: memref<1x32x32xbf16, #tpu.memory_space<vmem>>, %arg9: memref<1x1x32xf32, #tpu.memory_space<vmem>>, %arg10: memref<1x32x64xbf16, #tpu.memory_space<vmem>>, %arg11: memref<1x1x64xf32, #tpu.memory_space<vmem>>, %arg12: memref<1x64x32xbf16, #tpu.memory_space<vmem>>, %arg13: memref<1x1x32xf32, #tpu.memory_space<vmem>>, %arg14: memref<1x1x32xf32, #tpu.memory_space<vmem>>, %arg15: memref<1x1x32xf32, #tpu.memory_space<vmem>>, %arg16: memref<1x1x32xf32, #tpu.memory_space<vmem>>, %arg17: memref<1x1x32xf32, #tpu.memory_space<vmem>>, %arg18: memref<8x32xf32, #tpu.memory_space<vmem>>, %arg19: memref<8x32xf32, #tpu.memory_space<vmem>>) attributes {dimension_semantics = [#tpu.dimension_semantics<arbitrary>], iteration_bounds = array<i64: 2>, scalar_prefetch = 0 : i64, scratch_operands = 1 : i64, tpu.core_type = #tpu.core_type<tc>, window_params = [{pipeline_mode = #tpu.pipeline_mode<synchronous>, transform_indices = @transform_0, window_bounds = array<i64: 8, 32>}, {transform_indices = @transform_1, window_bounds = array<i64: 1, 32, 32>}, {transform_indices = @transform_2, window_bounds = array<i64: 1, 1, 32>}, {transform_indices = @transform_3, window_bounds = array<i64: 1, 32, 32>}, {transform_indices = @transform_4, window_bounds = array<i64: 1, 1, 32>}, {transform_indices = @transform_5, window_bounds = array<i64: 1, 32, 32>}, {transform_indices = @transform_6, window_bounds = array<i64: 1, 1, 32>}, {transform_indices = @transform_7, window_bounds = array<i64: 1, 32, 32>}, {transform_indices = @transform_8, window_bounds = array<i64: 1, 1, 32>}, {transform_indices = @transform_9, window_bounds = array<i64: 1, 32, 64>}, {transform_indices = @transform_10, window_bounds = array<i64: 1, 1, 64>}, {transform_indices = @transform_11, window_bounds = array<i64: 1, 64, 32>}, {transform_indices = @transform_12, window_bounds = array<i64: 1, 1, 32>}, {transform_indices = @transform_13, window_bounds = array<i64: 1, 1, 32>}, {transform_indices = @transform_14, window_bounds = array<i64: 1, 1, 32>}, {transform_indices = @transform_15, window_bounds = array<i64: 1, 1, 32>}, {transform_indices = @transform_16, window_bounds = array<i64: 1, 1, 32>}, {pipeline_mode = #tpu.pipeline_mode<synchronous>, transform_indices = @transform_17, window_bounds = array<i64: 8, 32>}]} {
    %c0_i32 = arith.constant 0 : i32
    %0 = arith.cmpi eq, %arg0, %c0_i32 : i32
    %1 = arith.extui %0 : i1 to i32
    %c0_i32_0 = arith.constant 0 : i32
    %2 = arith.cmpi ne, %1, %c0_i32_0 : i32
    scf.if %2 {
      %c0_85 = arith.constant 0 : index
      %c0_86 = arith.constant 0 : index
      %203 = vector.load %arg1[%c0_85, %c0_86] : memref<8x32xf32, #tpu.memory_space<vmem>>, vector<8x32xf32>
      %c0_87 = arith.constant 0 : index
      %c0_88 = arith.constant 0 : index
      %204 = vector.load %arg19[%c0_87, %c0_88] : memref<8x32xf32, #tpu.memory_space<vmem>>, vector<8x32xf32>
      tpu.vector_store %arg19[%c0_87, %c0_88], %203 {strides = array<i32>} : memref<8x32xf32, #tpu.memory_space<vmem>>, vector<8x32xf32>,
    } else {
    }
    %c0 = arith.constant 0 : index
    %c0_1 = arith.constant 0 : index
    %3 = vector.load %arg19[%c0, %c0_1] : memref<8x32xf32, #tpu.memory_space<vmem>>, vector<8x32xf32>
    %4 = arith.truncf %3 : vector<8x32xf32> to vector<8x32xbf16>
    %c0_2 = arith.constant 0 : index
    %c0_3 = arith.constant 0 : index
    %c0_4 = arith.constant 0 : index
    %5 = vector.load %arg2[%c0_2, %c0_3, %c0_4] : memref<1x32x32xbf16, #tpu.memory_space<vmem>>, vector<1x32x32xbf16>
    %6 = vector.shape_cast %5 : vector<1x32x32xbf16> to vector<32x32xbf16>
    %cst = arith.constant dense<0.000000e+00> : vector<8x32xf32>
    %7 = tpu.matmul %4, %6, %cst {dimension_numbers = #tpu.dot_dimension_numbers<[1], [0], [0], [1], [0, 0, 1, 1], [], []>} : vector<8x32xbf16>, vector<32x32xbf16>, vector<8x32xf32> -> vector<8x32xf32>
    %c0_5 = arith.constant 0 : index
    %c0_6 = arith.constant 0 : index
    %c0_7 = arith.constant 0 : index
    %8 = vector.load %arg3[%c0_5, %c0_6, %c0_7] : memref<1x1x32xf32, #tpu.memory_space<vmem>>, vector<1x1x32xf32>
    %9 = vector.shape_cast %8 : vector<1x1x32xf32> to vector<1x32xf32>
    %10 = vector.broadcast %9 : vector<1x32xf32> to vector<8x32xf32>
    %11 = arith.addf %7, %10 : vector<8x32xf32>
    %c0_8 = arith.constant 0 : index
    %c0_9 = arith.constant 0 : index
    %c0_10 = arith.constant 0 : index
    %12 = vector.load %arg4[%c0_8, %c0_9, %c0_10] : memref<1x32x32xbf16, #tpu.memory_space<vmem>>, vector<1x32x32xbf16>
    %13 = vector.shape_cast %12 : vector<1x32x32xbf16> to vector<32x32xbf16>
    %cst_11 = arith.constant dense<0.000000e+00> : vector<8x32xf32>
    %14 = tpu.matmul %4, %13, %cst_11 {dimension_numbers = #tpu.dot_dimension_numbers<[1], [0], [0], [1], [0, 0, 1, 1], [], []>} : vector<8x32xbf16>, vector<32x32xbf16>, vector<8x32xf32> -> vector<8x32xf32>
    %c0_12 = arith.constant 0 : index
    %c0_13 = arith.constant 0 : index
    %c0_14 = arith.constant 0 : index
    %15 = vector.load %arg5[%c0_12, %c0_13, %c0_14] : memref<1x1x32xf32, #tpu.memory_space<vmem>>, vector<1x1x32xf32>
    %16 = vector.shape_cast %15 : vector<1x1x32xf32> to vector<1x32xf32>
    %17 = vector.broadcast %16 : vector<1x32xf32> to vector<8x32xf32>
    %18 = arith.addf %14, %17 : vector<8x32xf32>
    %c0_15 = arith.constant 0 : index
    %c0_16 = arith.constant 0 : index
    %c0_17 = arith.constant 0 : index
    %19 = vector.load %arg6[%c0_15, %c0_16, %c0_17] : memref<1x32x32xbf16, #tpu.memory_space<vmem>>, vector<1x32x32xbf16>
    %20 = vector.shape_cast %19 : vector<1x32x32xbf16> to vector<32x32xbf16>
    %cst_18 = arith.constant dense<0.000000e+00> : vector<8x32xf32>
    %21 = tpu.matmul %4, %20, %cst_18 {dimension_numbers = #tpu.dot_dimension_numbers<[1], [0], [0], [1], [0, 0, 1, 1], [], []>} : vector<8x32xbf16>, vector<32x32xbf16>, vector<8x32xf32> -> vector<8x32xf32>
    %c0_19 = arith.constant 0 : index
    %c0_20 = arith.constant 0 : index
    %c0_21 = arith.constant 0 : index
    %22 = vector.load %arg7[%c0_19, %c0_20, %c0_21] : memref<1x1x32xf32, #tpu.memory_space<vmem>>, vector<1x1x32xf32>
    %23 = vector.shape_cast %22 : vector<1x1x32xf32> to vector<1x32xf32>
    %24 = vector.broadcast %23 : vector<1x32xf32> to vector<8x32xf32>
    %25 = arith.addf %21, %24 : vector<8x32xf32>
    %26 = vector.extract_strided_slice %11 {offsets = [0, 0], sizes = [8, 8], strides = [1, 1]} : vector<8x32xf32> to vector<8x8xf32>
    %27 = vector.shape_cast %26 : vector<8x8xf32> to vector<1x8x8xf32>
    %28 = vector.extract_strided_slice %18 {offsets = [0, 0], sizes = [8, 8], strides = [1, 1]} : vector<8x32xf32> to vector<8x8xf32>
    %29 = vector.shape_cast %28 : vector<8x8xf32> to vector<1x8x8xf32>
    %30 = vector.extract_strided_slice %25 {offsets = [0, 0], sizes = [8, 8], strides = [1, 1]} : vector<8x32xf32> to vector<8x8xf32>
    %31 = vector.shape_cast %30 : vector<8x8xf32> to vector<1x8x8xf32>
    %32 = arith.truncf %27 : vector<1x8x8xf32> to vector<1x8x8xbf16>
    %33 = arith.truncf %29 : vector<1x8x8xf32> to vector<1x8x8xbf16>
    "tpu.trace_start"() <{level = 10 : i32, message = "nsd,ntd->nst"}> : () -> ()
    %cst_22 = arith.constant dense<0.000000e+00> : vector<1x8x8xf32>
    %34 = tpu.matmul %32, %33, %cst_22 {dimension_numbers = #tpu.dot_dimension_numbers<[2], [2], [1], [1], [0, 0, 0, 1, 1, 1], [0], [0]>} : vector<1x8x8xbf16>, vector<1x8x8xbf16>, vector<1x8x8xf32> -> vector<1x8x8xf32>
    "tpu.trace_stop"() : () -> ()
    %cst_23 = arith.constant dense<0xFF800000> : vector<1x8xf32>
    %35 = vector.multi_reduction <maximumf>, %34, %cst_23 [2] : vector<1x8x8xf32> to vector<1x8xf32>
    %36 = vector.shape_cast %35 : vector<1x8xf32> to vector<1x8x1xf32>
    %37 = vector.broadcast %36 : vector<1x8x1xf32> to vector<1x8x8xf32>
    %38 = arith.subf %34, %37 : vector<1x8x8xf32>
    %39 = math.exp %38 : vector<1x8x8xf32>
    %cst_24 = arith.constant dense<0.000000e+00> : vector<1x8xf32>
    %40 = vector.multi_reduction <add>, %39, %cst_24 [2] : vector<1x8x8xf32> to vector<1x8xf32>
    %41 = vector.shape_cast %40 : vector<1x8xf32> to vector<1x8x1xf32>
    %42 = tpu.reciprocal %41 {approx = true} : vector<1x8x1xf32> -> vector<1x8x1xf32>
    %43 = vector.broadcast %42 : vector<1x8x1xf32> to vector<1x8x8xf32>
    %44 = arith.mulf %39, %43 : vector<1x8x8xf32>
    %45 = arith.truncf %44 : vector<1x8x8xf32> to vector<1x8x8xbf16>
    %46 = arith.truncf %31 : vector<1x8x8xf32> to vector<1x8x8xbf16>
    "tpu.trace_start"() <{level = 10 : i32, message = "nst,ntd->nsd"}> : () -> ()
    %cst_25 = arith.constant dense<0.000000e+00> : vector<1x8x8xf32>
    %47 = tpu.matmul %45, %46, %cst_25 {dimension_numbers = #tpu.dot_dimension_numbers<[2], [1], [1], [2], [0, 0, 0, 1, 1, 2], [0], [0]>} : vector<1x8x8xbf16>, vector<1x8x8xbf16>, vector<1x8x8xf32> -> vector<1x8x8xf32>
    "tpu.trace_stop"() : () -> ()
    %48 = vector.shape_cast %47 : vector<1x8x8xf32> to vector<8x8xf32>
    %49 = vector.extract_strided_slice %11 {offsets = [0, 8], sizes = [8, 8], strides = [1, 1]} : vector<8x32xf32> to vector<8x8xf32>
    %50 = vector.shape_cast %49 : vector<8x8xf32> to vector<1x8x8xf32>
    %51 = vector.extract_strided_slice %18 {offsets = [0, 8], sizes = [8, 8], strides = [1, 1]} : vector<8x32xf32> to vector<8x8xf32>
    %52 = vector.shape_cast %51 : vector<8x8xf32> to vector<1x8x8xf32>
    %53 = vector.extract_strided_slice %25 {offsets = [0, 8], sizes = [8, 8], strides = [1, 1]} : vector<8x32xf32> to vector<8x8xf32>
    %54 = vector.shape_cast %53 : vector<8x8xf32> to vector<1x8x8xf32>
    %55 = arith.truncf %50 : vector<1x8x8xf32> to vector<1x8x8xbf16>
    %56 = arith.truncf %52 : vector<1x8x8xf32> to vector<1x8x8xbf16>
    "tpu.trace_start"() <{level = 10 : i32, message = "nsd,ntd->nst"}> : () -> ()
    %cst_26 = arith.constant dense<0.000000e+00> : vector<1x8x8xf32>
    %57 = tpu.matmul %55, %56, %cst_26 {dimension_numbers = #tpu.dot_dimension_numbers<[2], [2], [1], [1], [0, 0, 0, 1, 1, 1], [0], [0]>} : vector<1x8x8xbf16>, vector<1x8x8xbf16>, vector<1x8x8xf32> -> vector<1x8x8xf32>
    "tpu.trace_stop"() : () -> ()
    %cst_27 = arith.constant dense<0xFF800000> : vector<1x8xf32>
    %58 = vector.multi_reduction <maximumf>, %57, %cst_27 [2] : vector<1x8x8xf32> to vector<1x8xf32>
    %59 = vector.shape_cast %58 : vector<1x8xf32> to vector<1x8x1xf32>
    %60 = vector.broadcast %59 : vector<1x8x1xf32> to vector<1x8x8xf32>
    %61 = arith.subf %57, %60 : vector<1x8x8xf32>
    %62 = math.exp %61 : vector<1x8x8xf32>
    %cst_28 = arith.constant dense<0.000000e+00> : vector<1x8xf32>
    %63 = vector.multi_reduction <add>, %62, %cst_28 [2] : vector<1x8x8xf32> to vector<1x8xf32>
    %64 = vector.shape_cast %63 : vector<1x8xf32> to vector<1x8x1xf32>
    %65 = tpu.reciprocal %64 {approx = true} : vector<1x8x1xf32> -> vector<1x8x1xf32>
    %66 = vector.broadcast %65 : vector<1x8x1xf32> to vector<1x8x8xf32>
    %67 = arith.mulf %62, %66 : vector<1x8x8xf32>
    %68 = arith.truncf %67 : vector<1x8x8xf32> to vector<1x8x8xbf16>
    %69 = arith.truncf %54 : vector<1x8x8xf32> to vector<1x8x8xbf16>
    "tpu.trace_start"() <{level = 10 : i32, message = "nst,ntd->nsd"}> : () -> ()
    %cst_29 = arith.constant dense<0.000000e+00> : vector<1x8x8xf32>
    %70 = tpu.matmul %68, %69, %cst_29 {dimension_numbers = #tpu.dot_dimension_numbers<[2], [1], [1], [2], [0, 0, 0, 1, 1, 2], [0], [0]>} : vector<1x8x8xbf16>, vector<1x8x8xbf16>, vector<1x8x8xf32> -> vector<1x8x8xf32>
    "tpu.trace_stop"() : () -> ()
    %71 = vector.shape_cast %70 : vector<1x8x8xf32> to vector<8x8xf32>
    %72 = vector.extract_strided_slice %11 {offsets = [0, 16], sizes = [8, 8], strides = [1, 1]} : vector<8x32xf32> to vector<8x8xf32>
    %73 = vector.shape_cast %72 : vector<8x8xf32> to vector<1x8x8xf32>
    %74 = vector.extract_strided_slice %18 {offsets = [0, 16], sizes = [8, 8], strides = [1, 1]} : vector<8x32xf32> to vector<8x8xf32>
    %75 = vector.shape_cast %74 : vector<8x8xf32> to vector<1x8x8xf32>
    %76 = vector.extract_strided_slice %25 {offsets = [0, 16], sizes = [8, 8], strides = [1, 1]} : vector<8x32xf32> to vector<8x8xf32>
    %77 = vector.shape_cast %76 : vector<8x8xf32> to vector<1x8x8xf32>
    %78 = arith.truncf %73 : vector<1x8x8xf32> to vector<1x8x8xbf16>
    %79 = arith.truncf %75 : vector<1x8x8xf32> to vector<1x8x8xbf16>
    "tpu.trace_start"() <{level = 10 : i32, message = "nsd,ntd->nst"}> : () -> ()
    %cst_30 = arith.constant dense<0.000000e+00> : vector<1x8x8xf32>
    %80 = tpu.matmul %78, %79, %cst_30 {dimension_numbers = #tpu.dot_dimension_numbers<[2], [2], [1], [1], [0, 0, 0, 1, 1, 1], [0], [0]>} : vector<1x8x8xbf16>, vector<1x8x8xbf16>, vector<1x8x8xf32> -> vector<1x8x8xf32>
    "tpu.trace_stop"() : () -> ()
    %cst_31 = arith.constant dense<0xFF800000> : vector<1x8xf32>
    %81 = vector.multi_reduction <maximumf>, %80, %cst_31 [2] : vector<1x8x8xf32> to vector<1x8xf32>
    %82 = vector.shape_cast %81 : vector<1x8xf32> to vector<1x8x1xf32>
    %83 = vector.broadcast %82 : vector<1x8x1xf32> to vector<1x8x8xf32>
    %84 = arith.subf %80, %83 : vector<1x8x8xf32>
    %85 = math.exp %84 : vector<1x8x8xf32>
    %cst_32 = arith.constant dense<0.000000e+00> : vector<1x8xf32>
    %86 = vector.multi_reduction <add>, %85, %cst_32 [2] : vector<1x8x8xf32> to vector<1x8xf32>
    %87 = vector.shape_cast %86 : vector<1x8xf32> to vector<1x8x1xf32>
    %88 = tpu.reciprocal %87 {approx = true} : vector<1x8x1xf32> -> vector<1x8x1xf32>
    %89 = vector.broadcast %88 : vector<1x8x1xf32> to vector<1x8x8xf32>
    %90 = arith.mulf %85, %89 : vector<1x8x8xf32>
    %91 = arith.truncf %90 : vector<1x8x8xf32> to vector<1x8x8xbf16>
    %92 = arith.truncf %77 : vector<1x8x8xf32> to vector<1x8x8xbf16>
    "tpu.trace_start"() <{level = 10 : i32, message = "nst,ntd->nsd"}> : () -> ()
    %cst_33 = arith.constant dense<0.000000e+00> : vector<1x8x8xf32>
    %93 = tpu.matmul %91, %92, %cst_33 {dimension_numbers = #tpu.dot_dimension_numbers<[2], [1], [1], [2], [0, 0, 0, 1, 1, 2], [0], [0]>} : vector<1x8x8xbf16>, vector<1x8x8xbf16>, vector<1x8x8xf32> -> vector<1x8x8xf32>
    "tpu.trace_stop"() : () -> ()
    %94 = vector.shape_cast %93 : vector<1x8x8xf32> to vector<8x8xf32>
    %95 = vector.extract_strided_slice %11 {offsets = [0, 24], sizes = [8, 8], strides = [1, 1]} : vector<8x32xf32> to vector<8x8xf32>
    %96 = vector.shape_cast %95 : vector<8x8xf32> to vector<1x8x8xf32>
    %97 = vector.extract_strided_slice %18 {offsets = [0, 24], sizes = [8, 8], strides = [1, 1]} : vector<8x32xf32> to vector<8x8xf32>
    %98 = vector.shape_cast %97 : vector<8x8xf32> to vector<1x8x8xf32>
    %99 = vector.extract_strided_slice %25 {offsets = [0, 24], sizes = [8, 8], strides = [1, 1]} : vector<8x32xf32> to vector<8x8xf32>
    %100 = vector.shape_cast %99 : vector<8x8xf32> to vector<1x8x8xf32>
    %101 = arith.truncf %96 : vector<1x8x8xf32> to vector<1x8x8xbf16>
    %102 = arith.truncf %98 : vector<1x8x8xf32> to vector<1x8x8xbf16>
    "tpu.trace_start"() <{level = 10 : i32, message = "nsd,ntd->nst"}> : () -> ()
    %cst_34 = arith.constant dense<0.000000e+00> : vector<1x8x8xf32>
    %103 = tpu.matmul %101, %102, %cst_34 {dimension_numbers = #tpu.dot_dimension_numbers<[2], [2], [1], [1], [0, 0, 0, 1, 1, 1], [0], [0]>} : vector<1x8x8xbf16>, vector<1x8x8xbf16>, vector<1x8x8xf32> -> vector<1x8x8xf32>
    "tpu.trace_stop"() : () -> ()
    %cst_35 = arith.constant dense<0xFF800000> : vector<1x8xf32>
    %104 = vector.multi_reduction <maximumf>, %103, %cst_35 [2] : vector<1x8x8xf32> to vector<1x8xf32>
    %105 = vector.shape_cast %104 : vector<1x8xf32> to vector<1x8x1xf32>
    %106 = vector.broadcast %105 : vector<1x8x1xf32> to vector<1x8x8xf32>
    %107 = arith.subf %103, %106 : vector<1x8x8xf32>
    %108 = math.exp %107 : vector<1x8x8xf32>
    %cst_36 = arith.constant dense<0.000000e+00> : vector<1x8xf32>
    %109 = vector.multi_reduction <add>, %108, %cst_36 [2] : vector<1x8x8xf32> to vector<1x8xf32>
    %110 = vector.shape_cast %109 : vector<1x8xf32> to vector<1x8x1xf32>
    %111 = tpu.reciprocal %110 {approx = true} : vector<1x8x1xf32> -> vector<1x8x1xf32>
    %112 = vector.broadcast %111 : vector<1x8x1xf32> to vector<1x8x8xf32>
    %113 = arith.mulf %108, %112 : vector<1x8x8xf32>
    %114 = arith.truncf %113 : vector<1x8x8xf32> to vector<1x8x8xbf16>
    %115 = arith.truncf %100 : vector<1x8x8xf32> to vector<1x8x8xbf16>
    "tpu.trace_start"() <{level = 10 : i32, message = "nst,ntd->nsd"}> : () -> ()
    %cst_37 = arith.constant dense<0.000000e+00> : vector<1x8x8xf32>
    %116 = tpu.matmul %114, %115, %cst_37 {dimension_numbers = #tpu.dot_dimension_numbers<[2], [1], [1], [2], [0, 0, 0, 1, 1, 2], [0], [0]>} : vector<1x8x8xbf16>, vector<1x8x8xbf16>, vector<1x8x8xf32> -> vector<1x8x8xf32>
    "tpu.trace_stop"() : () -> ()
    %117 = vector.shape_cast %116 : vector<1x8x8xf32> to vector<8x8xf32>
    %118 = tpu.concatenate %48, %71, %94, %117 in 1 : vector<8x8xf32>, vector<8x8xf32>, vector<8x8xf32>, vector<8x8xf32> -> vector<8x32xf32>
    %119 = arith.truncf %118 : vector<8x32xf32> to vector<8x32xbf16>
    %c0_38 = arith.constant 0 : index
    %c0_39 = arith.constant 0 : index
    %c0_40 = arith.constant 0 : index
    %120 = vector.load %arg8[%c0_38, %c0_39, %c0_40] : memref<1x32x32xbf16, #tpu.memory_space<vmem>>, vector<1x32x32xbf16>
    %121 = vector.shape_cast %120 : vector<1x32x32xbf16> to vector<32x32xbf16>
    %cst_41 = arith.constant dense<0.000000e+00> : vector<8x32xf32>
    %122 = tpu.matmul %119, %121, %cst_41 {dimension_numbers = #tpu.dot_dimension_numbers<[1], [0], [0], [1], [0, 0, 1, 1], [], []>} : vector<8x32xbf16>, vector<32x32xbf16>, vector<8x32xf32> -> vector<8x32xf32>
    %c0_42 = arith.constant 0 : index
    %c0_43 = arith.constant 0 : index
    %c0_44 = arith.constant 0 : index
    %123 = vector.load %arg9[%c0_42, %c0_43, %c0_44] : memref<1x1x32xf32, #tpu.memory_space<vmem>>, vector<1x1x32xf32>
    %124 = vector.shape_cast %123 : vector<1x1x32xf32> to vector<1x32xf32>
    %125 = vector.broadcast %124 : vector<1x32xf32> to vector<8x32xf32>
    %126 = arith.addf %122, %125 : vector<8x32xf32>
    %127 = arith.addf %3, %126 : vector<8x32xf32>
    %c0_45 = arith.constant 0 : index
    %c0_46 = arith.constant 0 : index
    %c0_47 = arith.constant 0 : index
    %128 = vector.load %arg14[%c0_45, %c0_46, %c0_47] : memref<1x1x32xf32, #tpu.memory_space<vmem>>, vector<1x1x32xf32>
    %129 = vector.shape_cast %128 : vector<1x1x32xf32> to vector<1x32xf32>
    %c0_48 = arith.constant 0 : index
    %c0_49 = arith.constant 0 : index
    %c0_50 = arith.constant 0 : index
    %130 = vector.load %arg15[%c0_48, %c0_49, %c0_50] : memref<1x1x32xf32, #tpu.memory_space<vmem>>, vector<1x1x32xf32>
    %131 = vector.shape_cast %130 : vector<1x1x32xf32> to vector<1x32xf32>
    %cst_51 = arith.constant dense<0.000000e+00> : vector<8xf32>
    %132 = vector.multi_reduction <add>, %127, %cst_51 [1] : vector<8x32xf32> to vector<8xf32>
    %133 = vector.shape_cast %132 : vector<8xf32> to vector<8x1xf32>
    %cst_52 = arith.constant 3.200000e+01 : f32
    %134 = vector.broadcast %cst_52 : f32 to vector<8x1xf32>
    %135 = arith.divf %133, %134 : vector<8x1xf32>
    %136 = vector.broadcast %135 : vector<8x1xf32> to vector<8x32xf32>
    %137 = arith.subf %127, %136 : vector<8x32xf32>
    %138 = arith.mulf %137, %137 : vector<8x32xf32>
    %cst_53 = arith.constant dense<0.000000e+00> : vector<8xf32>
    %139 = vector.multi_reduction <add>, %138, %cst_53 [1] : vector<8x32xf32> to vector<8xf32>
    %140 = vector.shape_cast %139 : vector<8xf32> to vector<8x1xf32>
    %cst_54 = arith.constant 3.200000e+01 : f32
    %141 = vector.broadcast %cst_54 : f32 to vector<8x1xf32>
    %142 = arith.divf %140, %141 : vector<8x1xf32>
    %143 = vector.broadcast %135 : vector<8x1xf32> to vector<8x32xf32>
    %144 = arith.subf %127, %143 : vector<8x32xf32>
    %cst_55 = arith.constant 9.99999974E-6 : f32
    %145 = vector.broadcast %cst_55 : f32 to vector<8x1xf32>
    %146 = arith.addf %142, %145 : vector<8x1xf32>
    %147 = math.rsqrt %146 : vector<8x1xf32>
    %148 = vector.broadcast %147 : vector<8x1xf32> to vector<8x32xf32>
    %149 = arith.mulf %144, %148 : vector<8x32xf32>
    %150 = vector.broadcast %129 : vector<1x32xf32> to vector<8x32xf32>
    %151 = arith.mulf %149, %150 : vector<8x32xf32>
    %152 = vector.broadcast %131 : vector<1x32xf32> to vector<8x32xf32>
    %153 = arith.addf %151, %152 : vector<8x32xf32>
    %154 = arith.truncf %153 : vector<8x32xf32> to vector<8x32xbf16>
    %c0_56 = arith.constant 0 : index
    %c0_57 = arith.constant 0 : index
    %c0_58 = arith.constant 0 : index
    %155 = vector.load %arg10[%c0_56, %c0_57, %c0_58] : memref<1x32x64xbf16, #tpu.memory_space<vmem>>, vector<1x32x64xbf16>
    %156 = vector.shape_cast %155 : vector<1x32x64xbf16> to vector<32x64xbf16>
    %cst_59 = arith.constant dense<0.000000e+00> : vector<8x64xf32>
    %157 = tpu.matmul %154, %156, %cst_59 {dimension_numbers = #tpu.dot_dimension_numbers<[1], [0], [0], [1], [0, 0, 1, 1], [], []>} : vector<8x32xbf16>, vector<32x64xbf16>, vector<8x64xf32> -> vector<8x64xf32>
    %c0_60 = arith.constant 0 : index
    %c0_61 = arith.constant 0 : index
    %c0_62 = arith.constant 0 : index
    %158 = vector.load %arg11[%c0_60, %c0_61, %c0_62] : memref<1x1x64xf32, #tpu.memory_space<vmem>>, vector<1x1x64xf32>
    %159 = vector.shape_cast %158 : vector<1x1x64xf32> to vector<1x64xf32>
    %160 = vector.broadcast %159 : vector<1x64xf32> to vector<8x64xf32>
    %161 = arith.addf %157, %160 : vector<8x64xf32>
    %cst_63 = arith.constant 0.000000e+00 : f32
    %162 = vector.broadcast %cst_63 : f32 to vector<8x64xf32>
    %163 = arith.maximumf %161, %162 : vector<8x64xf32>
    %164 = arith.truncf %163 : vector<8x64xf32> to vector<8x64xbf16>
    %c0_64 = arith.constant 0 : index
    %c0_65 = arith.constant 0 : index
    %c0_66 = arith.constant 0 : index
    %165 = vector.load %arg12[%c0_64, %c0_65, %c0_66] : memref<1x64x32xbf16, #tpu.memory_space<vmem>>, vector<1x64x32xbf16>
    %166 = vector.shape_cast %165 : vector<1x64x32xbf16> to vector<64x32xbf16>
    %cst_67 = arith.constant dense<0.000000e+00> : vector<8x32xf32>
    %167 = tpu.matmul %164, %166, %cst_67 {dimension_numbers = #tpu.dot_dimension_numbers<[1], [0], [0], [1], [0, 0, 1, 1], [], []>} : vector<8x64xbf16>, vector<64x32xbf16>, vector<8x32xf32> -> vector<8x32xf32>
    %c0_68 = arith.constant 0 : index
    %c0_69 = arith.constant 0 : index
    %c0_70 = arith.constant 0 : index
    %168 = vector.load %arg13[%c0_68, %c0_69, %c0_70] : memref<1x1x32xf32, #tpu.memory_space<vmem>>, vector<1x1x32xf32>
    %169 = vector.shape_cast %168 : vector<1x1x32xf32> to vector<1x32xf32>
    %170 = vector.broadcast %169 : vector<1x32xf32> to vector<8x32xf32>
    %171 = arith.addf %167, %170 : vector<8x32xf32>
    %172 = arith.addf %153, %171 : vector<8x32xf32>
    %c0_71 = arith.constant 0 : index
    %c0_72 = arith.constant 0 : index
    %c0_73 = arith.constant 0 : index
    %173 = vector.load %arg16[%c0_71, %c0_72, %c0_73] : memref<1x1x32xf32, #tpu.memory_space<vmem>>, vector<1x1x32xf32>
    %174 = vector.shape_cast %173 : vector<1x1x32xf32> to vector<1x32xf32>
    %c0_74 = arith.constant 0 : index
    %c0_75 = arith.constant 0 : index
    %c0_76 = arith.constant 0 : index
    %175 = vector.load %arg17[%c0_74, %c0_75, %c0_76] : memref<1x1x32xf32, #tpu.memory_space<vmem>>, vector<1x1x32xf32>
    %176 = vector.shape_cast %175 : vector<1x1x32xf32> to vector<1x32xf32>
    %cst_77 = arith.constant dense<0.000000e+00> : vector<8xf32>
    %177 = vector.multi_reduction <add>, %172, %cst_77 [1] : vector<8x32xf32> to vector<8xf32>
    %178 = vector.shape_cast %177 : vector<8xf32> to vector<8x1xf32>
    %cst_78 = arith.constant 3.200000e+01 : f32
    %179 = vector.broadcast %cst_78 : f32 to vector<8x1xf32>
    %180 = arith.divf %178, %179 : vector<8x1xf32>
    %181 = vector.broadcast %180 : vector<8x1xf32> to vector<8x32xf32>
    %182 = arith.subf %172, %181 : vector<8x32xf32>
    %183 = arith.mulf %182, %182 : vector<8x32xf32>
    %cst_79 = arith.constant dense<0.000000e+00> : vector<8xf32>
    %184 = vector.multi_reduction <add>, %183, %cst_79 [1] : vector<8x32xf32> to vector<8xf32>
    %185 = vector.shape_cast %184 : vector<8xf32> to vector<8x1xf32>
    %cst_80 = arith.constant 3.200000e+01 : f32
    %186 = vector.broadcast %cst_80 : f32 to vector<8x1xf32>
    %187 = arith.divf %185, %186 : vector<8x1xf32>
    %188 = vector.broadcast %180 : vector<8x1xf32> to vector<8x32xf32>
    %189 = arith.subf %172, %188 : vector<8x32xf32>
    %cst_81 = arith.constant 9.99999974E-6 : f32
    %190 = vector.broadcast %cst_81 : f32 to vector<8x1xf32>
    %191 = arith.addf %187, %190 : vector<8x1xf32>
    %192 = math.rsqrt %191 : vector<8x1xf32>
    %193 = vector.broadcast %192 : vector<8x1xf32> to vector<8x32xf32>
    %194 = arith.mulf %189, %193 : vector<8x32xf32>
    %195 = vector.broadcast %174 : vector<1x32xf32> to vector<8x32xf32>
    %196 = arith.mulf %194, %195 : vector<8x32xf32>
    %197 = vector.broadcast %176 : vector<1x32xf32> to vector<8x32xf32>
    %198 = arith.addf %196, %197 : vector<8x32xf32>
    %c0_82 = arith.constant 0 : index
    %c0_83 = arith.constant 0 : index
    %199 = vector.load %arg19[%c0_82, %c0_83] : memref<8x32xf32, #tpu.memory_space<vmem>>, vector<8x32xf32>
    tpu.vector_store %arg19[%c0_82, %c0_83], %198 {strides = array<i32>} : memref<8x32xf32, #tpu.memory_space<vmem>>, vector<8x32xf32>,
    %c1_i32 = arith.constant 1 : i32
    %200 = arith.cmpi eq, %arg0, %c1_i32 : i32
    %201 = arith.extui %200 : i1 to i32
    %c0_i32_84 = arith.constant 0 : i32
    %202 = arith.cmpi ne, %201, %c0_i32_84 : i32
    scf.if %202 {
      %c0_85 = arith.constant 0 : index
      %c0_86 = arith.constant 0 : index
      %203 = vector.load %arg18[%c0_85, %c0_86] : memref<8x32xf32, #tpu.memory_space<vmem>>, vector<8x32xf32>
      tpu.vector_store %arg18[%c0_85, %c0_86], %198 {strides = array<i32>} : memref<8x32xf32, #tpu.memory_space<vmem>>, vector<8x32xf32>,
    } else {
    }
    return
  }
  func.func @transform_0(%arg0: i32) -> (i32, i32) {
    %c0_i32 = arith.constant 0 : i32
    %c0_i32_0 = arith.constant 0 : i32
    %c0_i32_1 = arith.constant 0 : i32
    return %c0_i32, %c0_i32_0 : i32, i32
  }
  func.func @transform_1(%arg0: i32) -> (i32, i32, i32) {
    %c0_i32 = arith.constant 0 : i32
    %c0_i32_0 = arith.constant 0 : i32
    %c0_i32_1 = arith.constant 0 : i32
    return %arg0, %c0_i32, %c0_i32_0 : i32, i32, i32
  }
  func.func @transform_2(%arg0: i32) -> (i32, i32, i32) {
    %c0_i32 = arith.constant 0 : i32
    %c0_i32_0 = arith.constant 0 : i32
    %c0_i32_1 = arith.constant 0 : i32
    return %arg0, %c0_i32, %c0_i32_0 : i32, i32, i32
  }
  func.func @transform_3(%arg0: i32) -> (i32, i32, i32) {
    %c0_i32 = arith.constant 0 : i32
    %c0_i32_0 = arith.constant 0 : i32
    %c0_i32_1 = arith.constant 0 : i32
    return %arg0, %c0_i32, %c0_i32_0 : i32, i32, i32
  }
  func.func @transform_4(%arg0: i32) -> (i32, i32, i32) {
    %c0_i32 = arith.constant 0 : i32
    %c0_i32_0 = arith.constant 0 : i32
    %c0_i32_1 = arith.constant 0 : i32
    return %arg0, %c0_i32, %c0_i32_0 : i32, i32, i32
  }
  func.func @transform_5(%arg0: i32) -> (i32, i32, i32) {
    %c0_i32 = arith.constant 0 : i32
    %c0_i32_0 = arith.constant 0 : i32
    %c0_i32_1 = arith.constant 0 : i32
    return %arg0, %c0_i32, %c0_i32_0 : i32, i32, i32
  }
  func.func @transform_6(%arg0: i32) -> (i32, i32, i32) {
    %c0_i32 = arith.constant 0 : i32
    %c0_i32_0 = arith.constant 0 : i32
    %c0_i32_1 = arith.constant 0 : i32
    return %arg0, %c0_i32, %c0_i32_0 : i32, i32, i32
  }
  func.func @transform_7(%arg0: i32) -> (i32, i32, i32) {
    %c0_i32 = arith.constant 0 : i32
    %c0_i32_0 = arith.constant 0 : i32
    %c0_i32_1 = arith.constant 0 : i32
    return %arg0, %c0_i32, %c0_i32_0 : i32, i32, i32
  }
  func.func @transform_8(%arg0: i32) -> (i32, i32, i32) {
    %c0_i32 = arith.constant 0 : i32
    %c0_i32_0 = arith.constant 0 : i32
    %c0_i32_1 = arith.constant 0 : i32
    return %arg0, %c0_i32, %c0_i32_0 : i32, i32, i32
  }
  func.func @transform_9(%arg0: i32) -> (i32, i32, i32) {
    %c0_i32 = arith.constant 0 : i32
    %c0_i32_0 = arith.constant 0 : i32
    %c0_i32_1 = arith.constant 0 : i32
    return %arg0, %c0_i32, %c0_i32_0 : i32, i32, i32
  }
  func.func @transform_10(%arg0: i32) -> (i32, i32, i32) {
    %c0_i32 = arith.constant 0 : i32
    %c0_i32_0 = arith.constant 0 : i32
    %c0_i32_1 = arith.constant 0 : i32
    return %arg0, %c0_i32, %c0_i32_0 : i32, i32, i32
  }
  func.func @transform_11(%arg0: i32) -> (i32, i32, i32) {
    %c0_i32 = arith.constant 0 : i32
    %c0_i32_0 = arith.constant 0 : i32
    %c0_i32_1 = arith.constant 0 : i32
    return %arg0, %c0_i32, %c0_i32_0 : i32, i32, i32
  }
  func.func @transform_12(%arg0: i32) -> (i32, i32, i32) {
    %c0_i32 = arith.constant 0 : i32
    %c0_i32_0 = arith.constant 0 : i32
    %c0_i32_1 = arith.constant 0 : i32
    return %arg0, %c0_i32, %c0_i32_0 : i32, i32, i32
  }
  func.func @transform_13(%arg0: i32) -> (i32, i32, i32) {
    %c0_i32 = arith.constant 0 : i32
    %c0_i32_0 = arith.constant 0 : i32
    %c0_i32_1 = arith.constant 0 : i32
    return %arg0, %c0_i32, %c0_i32_0 : i32, i32, i32
  }
  func.func @transform_14(%arg0: i32) -> (i32, i32, i32) {
    %c0_i32 = arith.constant 0 : i32
    %c0_i32_0 = arith.constant 0 : i32
    %c0_i32_1 = arith.constant 0 : i32
    return %arg0, %c0_i32, %c0_i32_0 : i32, i32, i32
  }
  func.func @transform_15(%arg0: i32) -> (i32, i32, i32) {
    %c0_i32 = arith.constant 0 : i32
    %c0_i32_0 = arith.constant 0 : i32
    %c0_i32_1 = arith.constant 0 : i32
    return %arg0, %c0_i32, %c0_i32_0 : i32, i32, i32
  }
  func.func @transform_16(%arg0: i32) -> (i32, i32, i32) {
    %c0_i32 = arith.constant 0 : i32
    %c0_i32_0 = arith.constant 0 : i32
    %c0_i32_1 = arith.constant 0 : i32
    return %arg0, %c0_i32, %c0_i32_0 : i32, i32, i32
  }
  func.func @transform_17(%arg0: i32) -> (i32, i32) {
    %c0_i32 = arith.constant 0 : i32
    %c0_i32_0 = arith.constant 0 : i32
    %c0_i32_1 = arith.constant 0 : i32
    return %c0_i32, %c0_i32_0 : i32, i32
  }
}

</mosaic_0001>

<bundles_post_ra>
// kernel: transformer_encoder.1
= control target key start
LH: loop header
LB: loop body
LE: loop exit
PB: predicated region body
PF: predicated region fallthrough
CT: control target
= control target key end

     0   :  { %s2361_s0 = inlined_call_operand.vmem [shape: f32[8,32], index: 0, kind: input, shape index: {}]   ;;  %s2362_s1 = inlined_call_operand.vmem [shape: bf16[2,32,32], index: 1, kind: input, shape index: {}]   ;;  %s2363_s2 = inlined_call_operand.vmem [shape: f32[2,1,32], index: 2, kind: input, shape index: {}]   ;;  %s2364_s3 = inlined_call_operand.vmem [shape: bf16[2,32,32], index: 3, kind: input, shape index: {}]   ;;  %s2365_s4 = inlined_call_operand.vmem [shape: f32[2,1,32], index: 4, kind: input, shape index: {}]   ;;  %s2366_s5 = inlined_call_operand.vmem [shape: bf16[2,32,32], index: 5, kind: input, shape index: {}]   ;;  %s2367_s6 = inlined_call_operand.vmem [shape: f32[2,1,32], index: 6, kind: input, shape index: {}]   ;;  %s2368_s7 = inlined_call_operand.hbm [shape: bf16[2,32,32], index: 7, kind: input, shape index: {}]   ;;  %s2369_s8 = inlined_call_operand.vmem [shape: f32[2,1,32], index: 8, kind: input, shape index: {}]   ;;  %s2370_s9 = inlined_call_operand.hbm [shape: bf16[2,32,64], index: 9, kind: input, shape index: {}]   ;;  %s2371_s10 = inlined_call_operand.vmem [shape: f32[2,1,64], index: 10, kind: input, shape index: {}]   ;;  %s2372_s11 = inlined_call_operand.vmem [shape: bf16[2,64,32], index: 11, kind: input, shape index: {}]   ;;  %s2373_s12 = inlined_call_operand.vmem [shape: f32[2,1,32], index: 12, kind: input, shape index: {}]   ;;  %s2374_s13 = inlined_call_operand.vmem [shape: f32[2,1,32], index: 13, kind: input, shape index: {}]   ;;  %s2375_s14 = inlined_call_operand.vmem [shape: f32[2,1,32], index: 14, kind: input, shape index: {}]   ;;  %s2376_s15 = inlined_call_operand.vmem [shape: f32[2,1,32], index: 15, kind: input, shape index: {}]   ;;  %s2377_s16 = inlined_call_operand.vmem [shape: f32[2,1,32], index: 16, kind: input, shape index: {}]   ;;  %s2378_s17 = inlined_call_operand.hbm [shape: f32[8,32], index: 17, kind: output, shape index: {}]  }
   0x1   :  { %2386 = sst [smem:[#allocation17_spill]] %s2361_s0 }
   0x2   :  { %2387 = sst [smem:[#allocation18_spill]] %s2362_s1 }
   0x3   :  { %2388 = sst [smem:[#allocation19_spill]] %s2364_s3 }
   0x4   :  { %2389 = sst [smem:[#allocation20_spill]] %s2366_s5 }
   0x5   :  { %2390 = sst [smem:[#allocation21_spill]] %s2368_s7 }
   0x6   :  { %2391 = sst [smem:[#allocation22_spill]] %s2369_s8 }
   0x7   :  { %2392 = sst [smem:[#allocation23_spill]] %s2370_s9 }
   0x8   :  { %2393 = sst [smem:[#allocation24_spill]] %s2371_s10 }
   0x9   :  { %2394 = sst [smem:[#allocation25_spill]] %s2373_s12 }
   0xa   :  { %2395 = sst [smem:[#allocation26_spill]] %s2374_s13 }
   0xb   :  { %2396 = sst [smem:[#allocation27_spill]] %s2375_s14 }
   0xc   :  { %2397 = sst [smem:[#allocation28_spill]] %s2376_s15 }
   0xd   :  { %2398 = sst [smem:[#allocation29_spill]] %s2377_s16 }
   0xe   :  { %2399 = sst [smem:[#allocation30_spill]] %s2378_s17 }
   0xf   :  { %22 = vsyncpa [#allocation4], 0 }
  0x10   :  { %24 = vsyncpa [#allocation4 + $0x1], 0 }
  0x11   :  { %25 = vsyncpa [#allocation7], 0 }
  0x12   :  { %27 = vsyncpa [#allocation7 + $0x1], 0 }
  0x13   :  { %28 = vsyncpa [#allocation5], 0  ;;  %s2049_s24 = smov 0   ;;  %s2051_s25 = smov 0  }
  0x14   :  { %s2053_s26 = smov 0   ;;  %s2055_s27 = smov 0  }
  0x15 LB: > { %2400 = sst [smem:[#allocation12_spill]] %s1939_s25  ;;  %s2068_s28 = sadd.s32 4294967295, %s1947_s27   ;;  %s1947_s27 = sphi %s2055_s27, %s2438_s27   ;;  %s1943_s26 = sphi %s2053_s26, %s2441_s26   ;;  %s1939_s25 = sphi %s2051_s25, %s2440_s25   ;;  %s1935_s24 = sphi %s2049_s24, %s2439_s24  }
  0x16   : > { %2401 = sst [smem:[#allocation13_spill]] %s1943_s26  ;;  %s2071_s29 = sadd.s32 1, %s1947_s27  }
  0x17   : > { %2402 = sst [smem:[#allocation14_spill]] %s2071_s29  ;;  %s215_s0 = ssub.s32 %s1947_s27, %s2071_s29 }
  0x18   : > { %s218_s30 = sadd.s32 1, %s1943_s26  ;;  %p216_p0 = scmp.eq.s32.totalorder %s215_s0, 0 }
  0x19   : > { %p225_p1 = scmp.ne.s32.totalorder %s1943_s26, %s1939_s25  ;;  %p226_p2 = scmp.eq.s32.totalorder %s1947_s27, 0 }
  0x1a   : > { %p231_p3 = scmp.ne.s32.totalorder %s1939_s25, %s1935_s24  ;;  %p232_p5 = scmp.eq.s32.totalorder %s2068_s28, 0 }
  0x1b   : > { %s2081_s18 = scalar_select %p216_p0, %s1943_s26, %s218_s30  }
  0x1c   : > { %p2083_p4 = por %p226_p2, %p225_p1  ;;  %p1740_p6 = scmp.lt.s32.totalorder %s1947_s27, 2 }
  0x1d   : > { %2403 = sst [smem:[#allocation15_spill]] %s2081_s18  ;;  %p2089_p7 = por %p232_p5, %p231_p3 }
  0x1e   : > { %s2094_s20 = sand.u32 1, %s1943_s26   ;;  %s2383_s22 = sshll.u32 %s1947_s27, 4 }
  0x1f   : > { %s2382_s21 = sshll.u32 %s2094_s20, 4  ;;  %s2406_s7 = sld [smem:[#allocation21_spill]] }
  0x20   : > { %s559_s30 = scalar_lea.vmem [#allocation3], %s2382_s21  ;;  %p2107_p8 = pnand %p1740_p6, %p2083_p4 }
  0x21   : > { %s567_s18 = sshll.u32 %s559_s30, 4  ;;  %p1618_p9 = scmp.ge.s32.totalorder %s1947_s27, 1  ;;  %s568_s18 = int_to_ptr.vmem [resolvable:$true] %s567_s18 }
  0x22   : > { %s556_s17 = scalar_lea.sflag [#allocation4], %s2094_s20  ;;  %p1821_p11 = pneg %p2107_p8 }
  0x25   : > { %s564_s0 = scalar_lea.hbm %s2406_s7, %s2383_s22  ;;  %s1824_s24 = scalar_lea.hbm %s2406_s7, 32 }
  0x26   : > { %s565_s29 = sshll.u32 %s564_s0, 4  ;;  %s566_s29 = int_to_ptr.hbm [resolvable:$true] %s565_s29 }
  0x27   : > { %s1817_s16 = sshra.s32 %s566_s29, 4  ;;  %s1818_s16 = int_to_ptr.hbm [resolvable:$true] %s1817_s16 }
  0x28   : > { %s1819_s15 = scalar_lea.hbm %s1818_s16, 16  ;;  %p1825_p0 = scmp.lt.s32.totalorder %s1818_s16, %s2406_s7 }
  0x29   : > { %p1820_p10 = scmp.ne.s32.totalorder %s1818_s16, %s1819_s15  ;;  %p1826_p1 = scmp.lt.s32.totalorder %s1824_s24, %s1819_s15 }
  0x2b   : > { %p1822_p12 = pnand %p1821_p11, %p1820_p10  ;;  %p1827_p2 = por %p1826_p1, %p1825_p0 }
  0x2d   : > { %p1823_p13 = pneg %p1822_p12 }
  0x2f   : > { %p1828_p3 = pnand %p1827_p2, %p1823_p13 }
  0x31   : > { %1831 = shalt.err (!%p1828_p3)
}
  0x32   : > { %s1949_s21 = smov 64   ;;  %s1950_s22 = smov 4  }
  0x33   : > { %1736 = dma.hbm_to_vmem [thread:$0]  (!%p2107_p8), %s566_s29, 256, %s568_s18, %s556_s17, %s1949_s21, %s1949_s21, %s1950_s22  }
  0x34   : > { %p647_p4 = scmp.lt.s32.totalorder %s1947_s27, 3  ;;  %s2408_s23 = sshll.u32 %s1947_s27, 4 }
  0x35   : > { %s2409_s9 = sld [smem:[#allocation23_spill]]  ;;  %s2411_s30 = sshll.u32 %s2094_s20, 4 }
  0x36   : > { %p2134_p5 = pnand %p1618_p9, %p647_p4  ;;  %s587_s7 = scalar_lea.vmem [#allocation6], %s2411_s30 }
  0x37   : > { %s595_s14 = sshll.u32 %s587_s7, 4  ;;  %s584_s13 = scalar_lea.sflag [#allocation7], %s2094_s20  ;;  %s596_s14 = int_to_ptr.vmem [resolvable:$true] %s595_s14 }
  0x3b   : > { %s592_s15 = scalar_lea.hbm %s2409_s9, %s2408_s23  ;;  %s1854_s18 = scalar_lea.hbm %s2409_s9, 32 }
  0x3c   : > { %s593_s24 = sshll.u32 %s592_s15, 4  ;;  %s594_s24 = int_to_ptr.hbm [resolvable:$true] %s593_s24 }
  0x3d   : > { %s1847_s12 = sshra.s32 %s594_s24, 4  ;;  %s1848_s12 = int_to_ptr.hbm [resolvable:$true] %s1847_s12 }
  0x3e   : > { %s1849_s17 = scalar_lea.hbm %s1848_s12, 16  ;;  %p1855_p9 = scmp.lt.s32.totalorder %s1848_s12, %s2409_s9 }
  0x3f   : > { %p1850_p6 = scmp.ne.s32.totalorder %s1848_s12, %s1849_s17  ;;  %p1856_p13 = scmp.lt.s32.totalorder %s1854_s18, %s1849_s17 }
  0x41   : > { %p1852_p10 = pnand %p1850_p6, %p1821_p11  ;;  %p1857_p0 = por %p1856_p13, %p1855_p9 }
  0x43   : > { %p1853_p12 = pneg %p1852_p10 }
  0x45   : > { %p1858_p1 = pnand %p1857_p0, %p1853_p12 }
  0x47   : > { %1861 = shalt.err (!%p1858_p1)
}
  0x48   : > { %1739 = dma.hbm_to_vmem [thread:$0]  (!%p2107_p8), %s594_s24, 256, %s596_s14, %s584_s13, %s1949_s21, %s1949_s21, %s1950_s22  }
  0x49   : > { %651 = sbr.rel (%p2134_p5) target bundleno = 1986 (0x7c2), region = 88 }
  0x4e   : > { %s653_s7 = sand.u32 1, %s1939_s25  }
  0x4f   : > { %s1619_s20 = sshll.u32 %s653_s7, 4  ;;  %s654_s0 = scalar_lea.sflag [#allocation4], %s653_s7 }
  0x50   : > { %s2155_s15 = scalar_lea.vmem [#allocation3], %s1619_s20 }
  0x51   : > { %1922 = dma.done.wait (%p2089_p7), %s654_s0, 256  }
  0x52   : > { %1924 = vsyncadd (%p2089_p7), %s654_s0, 4294967040  ;;  %s664_s12 = scalar_lea.sflag [#allocation7], %s653_s7  ;;  %s2161_s30 = scalar_lea.vmem [#allocation6], %s1619_s20 }
  0x53   : > { %2412 = sst [smem:[#allocation16_spill]] %s2161_s30 }
  0x54   : > { %1926 = dma.done.wait (%p2089_p7), %s664_s12, 256  }
  0x55   : > { %1928 = vsyncadd (%p2089_p7), %s664_s12, 4294967040  ;;  %p769_p8 = scmp.lt.s32.totalorder %s2068_s28, 1  ;;  %s2413_s24 = sld [smem:[#allocation18_spill]] }
  0x56   : > { %s2414_s3 = sld [smem:[#allocation19_spill]]  ;;  %p1629_p7 = scmp.ne.s32.totalorder %s2068_s28, 0 }
  0x57   : > { %s2169_s13 = scalar_select %p769_p8, %s2068_s28, 1 }
  0x58   : > { %s2415_s5 = sld [smem:[#allocation20_spill]] }
  0x59   : > { %s1707_s14 = sshll.u32 %s2169_s13, 4  ;;  %s2418_s0 = sld [smem:[#allocation25_spill]] }
  0x5a   : > { %s2419_s1 = sld [smem:[#allocation26_spill]] }
  0x5b   : > { %s773_s17 = scalar_lea.vmem %s2413_s24, %s1707_s14  ;;  %s2420_s16 = sld [smem:[#allocation27_spill]] }
  0x5c   : > { %s781_s18 = scalar_lea.vmem %s2414_s3, %s1707_s14  ;;  %s1710_s3 = sshll.u32 %s2169_s13, 5 }
  0x5d   : > { %s2207_s7 = scalar_lea.vmem %s2372_s11, %s1710_s3  ;;  %s2421_s29 = sld [smem:[#allocation28_spill]] }
  0x5e   : > { %s2189_s12 = scalar_lea.vmem %s2415_s5, %s1707_s14  ;;  %s2422_s3 = sld [smem:[#allocation29_spill]] }
  0x5f   : > { %s806_s5 = scalar_lea.vmem %s2418_s0, %s2169_s13  ;;  %s2423_s0 = sld [smem:[#allocation17_spill]] (!%p1629_p7) }
  0x60   : > { %s809_s25 = scalar_lea.vmem %s2419_s1, %s2169_s13  ;;  %823 = sbr.rel (%p1629_p7) target bundleno = 103 (0x67), region = 100 }
  0x61   : > { %s812_s30 = scalar_lea.vmem %s2420_s16, %s2169_s13 }
  0x63   : > { %s815_s10 = scalar_lea.vmem %s2421_s29, %s2169_s13 }
  0x64   : > { %s818_s19 = scalar_lea.vmem %s2422_s3, %s2169_s13 }
  0x65   : > { %v824_v0 = vld [vmem:[%s2423_s0] sm:$0xff]  ;;  %vm825_vm0 = vcmask 261120  }
  0x66   : > { %826 = vst.msk [vmem:[#allocation2] sm:$0xff] %vm825_vm0, %v824_v0 }
  0x67 PF: > { %v1712_v1 = vld [vmem:[%s773_s17 + $0x8] sm:$0xff]  ;;  %v1711_v3 = vld [vmem:[%s773_s17] sm:$0xff]  ;;  %vm849_vm1 = vcmask 261120   ;;  %s2424_s16 = scalar_lea.vmem %s2363_s2, %s2169_s13  ;;  %s2425_s29 = scalar_lea.vmem %s2365_s4, %s2169_s13  ;;  %vm934_vm2 = vcmask 64512   ;;  %vm970_vm3 = vcmask 1043456   ;;  %vm1177_vm4 = vcmask 130048  }
  0x68   : > { %v1714_v2 = vld [vmem:[%s781_s18 + $0x8] sm:$0xff]  ;;  %v1713_v4 = vld [vmem:[%s781_s18] sm:$0xff]  ;;  %859 = vmatpush.bf16.msra.mxu0 %v1712_v1  ;;  %s1951_s9 = smov 112   ;;  %s1952_s26 = smov 120   ;;  %vm1179_vm5 = vcmask 195584   ;;  %vm1333_vm10 = vcmask 523264  }
  0x69   : > { %892 = vmatpush.bf16.msra.mxu1 %v1714_v2  ;;  %v1785_v7 = vld [vmem:[%s2424_s16] ss:$0 sm:$0xff]  ;;  %s1953_s21 = smov 104   ;;  %v1716_v22 = vld [vmem:[%s2189_s12 + $0x8] sm:$0xff]  ;;  %s2426_s24 = scalar_lea.vmem %s2367_s6, %s2169_s13 }
  0x6a   : > { %v1786_v8 = vld [vmem:[%s2425_s29] ss:$0 sm:$0xff]  ;;  %925 = vmatpush.bf16.msra.mxu2 %v1716_v22  ;;  %s1954_s27 = smov 8   ;;  %s1955_s23 = smov 24  }
  0x6b   : > { %v1715_v35 = vld [vmem:[%s2189_s12] sm:$0xff]  ;;  %s1956_s3 = smov 16   ;;  %s2427_s0 = sld [smem:[#allocation22_spill]] }
  0x6c   : > { %860 = vmatpush.bf16.msra.mxu0 %v1711_v3  ;;  %v1787_v50 = vld [vmem:[%s2426_s24] ss:$0 sm:$0xff]  ;;  %p1700_p11 = scmp.ne.s32.totalorder %s2068_s28, 1 }
  0x6d   : > { %v2233_v5 = vld [vmem:[#allocation2] sm:$0xff]  ;;  %893 = vmatpush.bf16.msra.mxu1 %v1713_v4 }
  0x6e   : > { %v828_v6 = vpack.c.bf16 %v2233_v5, %v2233_v5  ;;  %926 = vmatpush.bf16.msra.mxu2 %v1715_v35 }
  0x70   : > { %1638 = vmatmul.msk.bf16.vlgmr.msra.gmra.mxu0 %vm849_vm1, %v828_v6  ;;  %1647 = vmatmul.msk.bf16.vlgmr.msra.gmra.mxu1 %vm849_vm1, %v828_v6 }
  0x71   : > { %1656 = vmatmul.msk.bf16.vlgmr.msra.gmra.mxu2 %vm849_vm1, %v828_v6  ;;  %s2428_s8 = scalar_lea.vmem %s2427_s0, %s2169_s13 }
  0xed   : > { %v862_v9 = vpop.f32.mrf.mxu0  ;;  %v895_v10 = vpop.f32.mrf.mxu1 }
  0xee   : > { %v863_v11 = vadd.f32 %v1785_v7, %v862_v9  ;;  %v896_v12 = vadd.f32 %v1786_v8, %v895_v10 }
  0xf0   : > { %v932_v13 = vpack.c.bf16 %v863_v11, %v863_v11  ;;  %v933_v14 = vpack.c.bf16 %v896_v12, %v896_v12 }
  0xf2   : > { %v988_v15 = vunpack.c.l.b16 %v932_v13  ;;  %v993_v16 = vunpack.c.l.b16 %v933_v14  ;;  %v939_v17 = vsel %vm934_vm2, %v933_v14, 0 }
  0xf3   : > { %948 = vmatpush.bf16.xpose.msra.mxu3 %v939_v17 }
  0xf4   : > { %v989_v18 = vpack.c.b16 %v988_v15, %v988_v15  ;;  %v994_v19 = vpack.c.b16 %v993_v16, %v993_v16  ;;  %v928_v51 = vpop.f32.mrf.mxu2 }
  0xf5   : > { %v864_v20 = vpop.f32.mrf.mxu0  ;;  %v897_v21 = vpop.f32.mrf.mxu1  ;;  %v929_v52 = vadd.f32 %v1787_v50, %v928_v51 }
  0xf6   : > { %1054 = vrot.lane.b32.xlu1 %v994_v19, %s1951_s9  ;;  %995 = vrot.lane.b32.xlu0 %v994_v19, %s1952_s26 }
  0xf7   : > { %1052 = vrot.lane.b32.xlu2 %v989_v18, %s1951_s9  ;;  %v966_v53 = vpack.c.bf16 %v929_v52, %v929_v52 }
  0xf9   : > { %v1029_v54 = vunpack.c.l.b16 %v966_v53  ;;  %v972_v55 = vsel %vm970_vm3, %v966_v53, 0 }
  0xfa   : > { %1657 = vmatmul.msk.bf16.vlgmr.msra.gmra.mxu3 %vm934_vm2, %v932_v13  ;;  %981 = vmatpush.bf16.msrb.mxu0 %v972_v55  ;;  %v1957_v55 = vmov 32.0  }
  0xfb   : > { %v1030_v56 = vpack.c.b16 %v1029_v54, %v1029_v54 }
  0xfc   : > { %v930_v57 = vpop.f32.mrf.mxu2 }
  0xfe   : > { %1110 = vrot.lane.b32.xlu1 %v994_v19, %s1953_s21  ;;  %990 = vrot.lane.b32.xlu0 %v989_v18, %s1952_s26 }
  0xff   : > { %1108 = vrot.lane.b32.xlu2 %v989_v18, %s1953_s21 }
 0x151   : > { %v1053_v27 = vpop.permute.xlu2 %1052 }
 0x159   : > { %v1109_v33 = vpop.permute.xlu2 %1108 }
 0x168   : > { %v1055_v23 = vpop.permute.xlu1 %1054  ;;  %v996_v24 = vpop.permute.xlu0 %995 }
 0x169   : > { %v1001_v25 = vsel %vm934_vm2, %v996_v24, 0  ;;  %v1060_v26 = vsel %vm934_vm2, %v1055_v23, 0 }
 0x16a   : > { %1010 = vmatpush.bf16.xpose.msrb.mxu1 %v1001_v25  ;;  %1069 = vmatpush.bf16.xpose.msrb.mxu3 %v1060_v26 }
 0x170   : > { %v1111_v28 = vpop.permute.xlu1 %1110  ;;  %v991_v29 = vpop.permute.xlu0 %990 }
 0x171   : > { %v1116_v30 = vsel %vm934_vm2, %v1111_v28, 0  ;;  %1659 = vmatmul.msk.bf16.vlgmr.msrb.gmra.mxu1 %vm934_vm2, %v991_v29  ;;  %1661 = vmatmul.msk.bf16.vlgmr.msrb.gmra.mxu3 %vm934_vm2, %v1053_v27 }
 0x172   : > { %1125 = vmatpush.bf16.xpose.msra.mxu1 %v1116_v30 }
 0x17d   : > { %v950_v31 = vpop.f32.mrf.mxu3 }
 0x17e   : > { %v954_v32 = vsel %vm934_vm2, %v950_v31, -inf }
 0x17f   : > { %955 = vmax.xlane.f32.xlu1 %v954_v32 }
 0x181   : > { %1663 = vmatmul.msk.bf16.vlgmr.msra.gmra.mxu1 %vm934_vm2, %v1109_v33 }
 0x185   : > { %v952_v34 = vpop.f32.mrf.mxu3 }
 0x1ee   : > { %v1012_v36 = vpop.f32.mrf.mxu1 }
 0x1ef   : > { %v1016_v37 = vsel %vm934_vm2, %v1012_v36, -inf }
 0x1f0   : > { %1017 = vmax.xlane.f32.xlu0 %v1016_v37 }
 0x1f2   : > { %v956_v38 = vpop.xlane.xlu1 %955 }
 0x1f3   : > { %v957_v39 = vsub.f32 %v950_v31, %v956_v38 }
 0x1f4   : > { %v1071_v40 = vpop.f32.mrf.mxu3 }
 0x1f5   : > { %v958_v41 = vmul.f32 1.442695, %v957_v39  ;;  %v1075_v49 = vsel %vm934_vm2, %v1071_v40, -inf }
 0x1f6   : > { %v1014_v42 = vpop.f32.mrf.mxu1 }
 0x1f7   : > { %1795 = vpow2.f32 %v958_v41  ;;  %v1717_v41 = vld [vmem:[%s2155_s15] sm:$0xff] }
 0x1fc   : > { %v1073_v43 = vpop.f32.mrf.mxu3 }
 0x1fd   : > { %v1796_v44 = vpop.eup %1795 }
 0x1fe   : > { %v1127_v45 = vpop.f32.mrf.mxu1  ;;  %v960_v46 = vsel %vm934_vm2, %v1796_v44, 0.0 }
 0x1ff   : > { %961 = vadd.xlane.f32.xlu1 %v960_v46  ;;  %v1131_v47 = vsel %vm934_vm2, %v1127_v45, -inf }
 0x200   : > { %1132 = vmax.xlane.f32.xlu2 %v1131_v47 }
 0x206   : > { %v1129_v48 = vpop.f32.mrf.mxu1 }
 0x208   : > { %1076 = vmax.xlane.f32.xlu2 %v1075_v49  ;;  %v1788_v49 = vld [vmem:[%s2428_s8] ss:$0 sm:$0xff] }
 0x220   : > { %1031 = vrot.lane.b32.xlu2 %v1030_v56, %s1952_s26 }
 0x263   : > { %v1018_v58 = vpop.xlane.xlu0 %1017 }
 0x264   : > { %v1019_v59 = vsub.f32 %v1012_v36, %v1018_v58 }
 0x266   : > { %v1020_v60 = vmul.f32 1.442695, %v1019_v59 }
 0x268   : > { %1797 = vpow2.f32 %v1020_v60 }
 0x26e   : > { %v1798_v61 = vpop.eup %1797 }
 0x26f   : > { %v1022_v62 = vsel %vm934_vm2, %v1798_v61, 0.0 }
 0x270   : > { %1023 = vadd.xlane.f32.xlu0 %v1022_v62 }
 0x272   : > { %v962_v63 = vpop.xlane.xlu1 %961 }
 0x273   : > { %1799 = vrcp.f32 %v962_v63  ;;  %v1133_v0 = vpop.xlane.xlu2 %1132 }
 0x274   : > { %v1134_v1 = vsub.f32 %v1127_v45, %v1133_v0 }
 0x276   : > { %v1135_v2 = vmul.f32 1.442695, %v1134_v1 }
 0x278   : > { %1801 = vpow2.f32 %v1135_v2 }
 0x279   : > { %v1800_v3 = vpop.eup %1799 }
 0x27a   : > { %v964_v4 = vmul.f32 %v1800_v3, %v1796_v44 }
 0x27b   : > { %v1077_v6 = vpop.xlane.xlu2 %1076 }
 0x27c   : > { %v1078_v7 = vsub.f32 %v1071_v40, %v1077_v6  ;;  %v965_v8 = vpack.c.bf16 %v964_v4, %v964_v4  ;;  %v1718_v40 = vld [vmem:[%s2155_s15 + $0x8] sm:$0xff]  ;;  %s2429_s15 = sld [smem:[#allocation16_spill]]  ;;  %v1724_v4 = vld [vmem:[%s2207_s7 + $0x18] sm:$0xff] }
 0x27d   : > { %1211 = vmatpush.bf16.msra.mxu3 %v1718_v40  ;;  %1341 = vmatpush.bf16.msrb.mxu1 %v1724_v4 }
 0x27e   : > { %v1802_v9 = vpop.eup %1801  ;;  %v1079_v10 = vmul.f32 1.442695, %v1078_v7  ;;  %1658 = vmatmul.msk.bf16.vlgmr.msrb.gmra.mxu0 %vm934_vm2, %v965_v8  ;;  %v1723_v8 = vld [vmem:[%s2207_s7 + $0x10] sm:$0xff] }
 0x27f   : > { %v1137_v11 = vsel %vm934_vm2, %v1802_v9, 0.0 }
 0x280   : > { %1803 = vpow2.f32 %v1079_v10  ;;  %1138 = vadd.xlane.f32.xlu0 %v1137_v11 }
 0x281   : > { %1212 = vmatpush.bf16.msra.mxu3 %v1717_v41  ;;  %1342 = vmatpush.bf16.msrb.mxu1 %v1723_v8 }
 0x282   : > { %v1720_v2 = vld [vmem:[%s2429_s15 + $0x8] sm:$0xff]  ;;  %v1719_v3 = vld [vmem:[%s2429_s15] sm:$0xff] }
 0x283   : > { %v1032_v14 = vpop.permute.xlu2 %1031 }
 0x284   : > { %v1037_v15 = vsel %vm970_vm3, %v1032_v14, 0 }
 0x285   : > { %1046 = vmatpush.bf16.msrb.mxu2 %v1037_v15 }
 0x286   : > { %v1804_v12 = vpop.eup %1803 }
 0x287   : > { %v1081_v13 = vsel %vm934_vm2, %v1804_v12, 0.0 }
 0x288   : > { %1082 = vadd.xlane.f32.xlu1 %v1081_v13 }
 0x294   : > { %1143 = vrot.lane.b32.xlu0 %v1030_v56, %s1953_s21  ;;  %s2432_s21 = sld [smem:[#allocation24_spill]] }
 0x29a   : > { %s2433_s12 = scalar_lea.vmem %s2432_s21, %s2169_s13 }
 0x2a1   : > { %1087 = vrot.lane.b32.xlu1 %v1030_v56, %s1951_s9 }
 0x2e3   : > { %v1024_v16 = vpop.xlane.xlu0 %1023 }
 0x2e4   : > { %1805 = vrcp.f32 %v1024_v16  ;;  %v1789_v16 = vld [vmem:[%s809_s25] ss:$0 sm:$0xff] }
 0x2ea   : > { %v1806_v17 = vpop.eup %1805 }
 0x2eb   : > { %v1026_v18 = vmul.f32 %v1806_v17, %v1798_v61 }
 0x2ed   : > { %v1027_v19 = vpack.c.bf16 %v1026_v18, %v1026_v18  ;;  %v1790_v18 = vld [vmem:[%s812_s30] ss:$0 sm:$0xff] }
 0x2ef   : > { %1660 = vmatmul.msk.bf16.vlgmr.msrb.gmra.mxu2 %vm934_vm2, %v1027_v19 }
 0x2f3   : > { %v1139_v20 = vpop.xlane.xlu0 %1138 }
 0x2f4   : > { %1807 = vrcp.f32 %v1139_v20 }
 0x2fa   : > { %v1808_v22 = vpop.eup %1807 }
 0x2fb   : > { %v983_v21 = vpop.f32.mrf.mxu0  ;;  %v1141_v24 = vmul.f32 %v1808_v22, %v1802_v9  ;;  %v1083_v25 = vpop.xlane.xlu1 %1082 }
 0x2fc   : > { %1809 = vrcp.f32 %v1083_v25  ;;  %v1791_v25 = vld [vmem:[%s2433_s12] ss:$0 sm:$0xff] }
 0x2fd   : > { %v1142_v28 = vpack.c.bf16 %v1141_v24, %v1141_v24  ;;  %1811 = vrcp.f32 %v1957_v55  ;;  %v1721_v24 = vld [vmem:[%s2207_s7] sm:$0xff] }
 0x302   : > { %v1810_v29 = vpop.eup %1809 }
 0x303   : > { %v985_v23 = vpop.f32.mrf.mxu0  ;;  %v1085_v30 = vmul.f32 %v1810_v29, %v1804_v12  ;;  %v1812_v56 = vpop.eup %1811 }
 0x304   : > { %v1225_v57 = vmul.f32 32.0, %v1812_v56  ;;  %vm1229_vm6 = vweird.f32 %v1812_v56  ;;  %v1722_v23 = vld [vmem:[%s2207_s7 + $0x8] sm:$0xff] }
 0x305   : > { %v1086_v33 = vpack.c.bf16 %v1085_v30, %v1085_v30  ;;  %1343 = vmatpush.bf16.msrb.mxu1 %v1722_v23 }
 0x306   : > { %v1144_v26 = vpop.permute.xlu0 %1143  ;;  %v1226_v58 = vsub.f32 1.0, %v1225_v57 }
 0x307   : > { %v1149_v27 = vsel %vm970_vm3, %v1144_v26, 0 }
 0x308   : > { %1158 = vmatpush.bf16.msra.mxu2 %v1149_v27  ;;  %v1227_v59 = vmul.f32 %v1812_v56, %v1226_v58 }
 0x309   : > { %1344 = vmatpush.bf16.msrb.mxu1 %v1721_v24 }
 0x30a   : > { %v1228_v60 = vadd.f32 %v1812_v56, %v1227_v59 }
 0x30b   : > { %1664 = vmatmul.msk.bf16.vlgmr.msra.gmra.mxu2 %vm934_vm2, %v1142_v28 }
 0x30c   : > { %v1230_v61 = vsel %vm1229_vm6, %v1812_v56, %v1228_v60 }
 0x313   : > { %v1088_v31 = vpop.permute.xlu1 %1087 }
 0x314   : > { %v1093_v32 = vsel %vm970_vm3, %v1088_v31, 0  ;;  %v1792_v31 = vld [vmem:[%s806_s5] ss:$0 sm:$0xff] }
 0x315   : > { %1102 = vmatpush.bf16.msra.mxu0 %v1093_v32 }
 0x318   : > { %1662 = vmatmul.msk.bf16.vlgmr.msra.gmra.mxu0 %vm934_vm2, %v1086_v33 }
 0x319   : > { %1288 = vmatpush.bf16.msrb.mxu0 %v1720_v2 }
 0x31d   : > { %1289 = vmatpush.bf16.msrb.mxu0 %v1719_v3 }
 0x372   : > { %v1048_v34 = vpop.f32.mrf.mxu2 }
 0x373   : > { %1165 = vrot.lane.b32.xlu2 %v1048_v34, %s1954_s27 }
 0x37a   : > { %v1050_v35 = vpop.f32.mrf.mxu2 }
 0x38e   : > { %v1160_v36 = vpop.f32.mrf.mxu2 }
 0x38f   : > { %1173 = vrot.lane.b32.xlu2 %v1160_v36, %s1955_s23 }
 0x395   : > { %v1104_v37 = vpop.f32.mrf.mxu0 }
 0x396   : > { %1169 = vrot.lane.b32.xlu0 %v1104_v37, %s1956_s3  ;;  %v1162_v38 = vpop.f32.mrf.mxu2 }
 0x39d   : > { %v1106_v39 = vpop.f32.mrf.mxu0 }
 0x3cd   : > { %v1166_v42 = vpop.permute.xlu2 %1165 }
 0x3ce   : > { %v1176_v43 = vsel %vm934_vm2, %v983_v21, %v1166_v42 }
 0x3e9   : > { %v1174_v45 = vpop.permute.xlu2 %1173 }
 0x408   : > { %v1170_v44 = vpop.permute.xlu0 %1169 }
 0x409   : > { %v1178_v46 = vsel %vm1177_vm4, %v1176_v43, %v1170_v44 }
 0x40a   : > { %v1180_v47 = vsel %vm1179_vm5, %v1178_v46, %v1174_v45 }
 0x40b   : > { %v1181_v48 = vpack.c.bf16 %v1180_v47, %v1180_v47 }
 0x40d   : > { %1673 = vmatmul.msk.bf16.vlgmr.msra.gmra.mxu3 %vm849_vm1, %v1181_v48 }
 0x490   : > { %v1214_v50 = vpop.f32.mrf.mxu3 }
 0x491   : > { %v1215_v51 = vadd.f32 %v1788_v49, %v1214_v50 }
 0x493   : > { %v1218_v52 = vadd.f32 %v1215_v51, %v2233_v5  ;;  %v1793_v51 = vld [vmem:[%s815_s10] ss:$0 sm:$0xff] }
 0x495   : > { %v1221_v53 = vsel %vm849_vm1, %v1218_v52, 0.0 }
 0x496   : > { %1222 = vadd.xlane.f32.xlu1 %v1221_v53  ;;  %v1794_v53 = vld [vmem:[%s818_s19] ss:$0 sm:$0xff] }
 0x498   : > { %v1216_v54 = vpop.f32.mrf.mxu3 }
 0x509   : > { %v1223_v62 = vpop.xlane.xlu1 %1222 }
 0x50a   : > { %v1231_v63 = vmul.f32 %v1230_v61, %v1223_v62 }
 0x50c   : > { %v1232_v5 = vsub.f32 %v1218_v52, %v1231_v63 }
 0x50e   : > { %v1233_v0 = vmul.f32 %v1232_v5, %v1232_v5 }
 0x510   : > { %v1234_v1 = vsel %vm849_vm1, %v1233_v0, 0.0 }
 0x511   : > { %1235 = vadd.xlane.f32.xlu0 %v1234_v1 }
 0x584   : > { %v1236_v6 = vpop.xlane.xlu0 %1235 }
 0x585   : > { %v1237_v7 = vmul.f32 %v1236_v6, %v1230_v61 }
 0x587   : > { %v1238_v9 = vadd.f32 1e-05, %v1237_v7 }
 0x589   : > { %1813 = vrsqrt.f32 %v1238_v9  ;;  %vm1245_vm8 = vweird.f32 %v1238_v9 }
 0x58f   : > { %v1814_v10 = vpop.eup %1813 }
 0x590   : > { %v1240_v11 = vmul.f32 %v1814_v10, %v1238_v9  ;;  %vm1246_vm7 = vweird.f32 %v1814_v10 }
 0x591   : > { %vm1247_vm9 = vmor %vm1245_vm8, %vm1246_vm7 }
 0x592   : > { %v1241_v12 = vmul.f32 %v1814_v10, %v1240_v11 }
 0x594   : > { %v1242_v13 = vmul.f32 0.5, %v1241_v12 }
 0x596   : > { %v1243_v14 = vsub.f32 1.5, %v1242_v13 }
 0x598   : > { %v1244_v15 = vmul.f32 %v1814_v10, %v1243_v14 }
 0x59a   : > { %v1248_v17 = vsel %vm1247_vm9, %v1814_v10, %v1244_v15 }
 0x59b   : > { %v1249_v19 = vmul.f32 %v1248_v17, %v1232_v5 }
 0x59d   : > { %v1253_v20 = vmul.f32 %v1789_v16, %v1249_v19 }
 0x59f   : > { %v1257_v21 = vadd.f32 %v1790_v18, %v1253_v20 }
 0x5a1   : > { %v1258_v22 = vpack.c.bf16 %v1257_v21, %v1257_v21 }
 0x5a3   : > { %1682 = vmatmul.msk.bf16.vlgmr.msrb.gmra.mxu0 %vm849_vm1, %v1258_v22 }
 0x620   : > { %v1291_v26 = vpop.f32.mrf.mxu0 }
 0x621   : > { %v1292_v27 = vadd.f32 %v1791_v25, %v1291_v26 }
 0x623   : > { %v1295_v28 = vmax.f32 %v1292_v27, 0.0 }
 0x625   : > { %v1296_v29 = vpack.c.bf16 %v1295_v28, %v1295_v28 }
 0x627   : > { %1699 = vmatmul.msk.bf16.vlgmr.msrb.gmra.mxu1 %vm1333_vm10, %v1296_v29 }
 0x628   : > { %v1293_v30 = vpop.f32.mrf.mxu0 }
 0x6a4   : > { %v1346_v32 = vpop.f32.mrf.mxu1 }
 0x6a5   : > { %v1347_v33 = vadd.f32 %v1792_v31, %v1346_v32 }
 0x6a7   : > { %v1350_v34 = vadd.f32 %v1347_v33, %v1257_v21 }
 0x6a9   : > { %v1353_v35 = vsel %vm849_vm1, %v1350_v34, 0.0 }
 0x6aa   : > { %1354 = vadd.xlane.f32.xlu2 %v1353_v35 }
 0x6ac   : > { %v1348_v36 = vpop.f32.mrf.mxu1 }
 0x71d   : > { %v1355_v37 = vpop.xlane.xlu2 %1354 }
 0x71e   : > { %v1356_v38 = vmul.f32 %v1355_v37, %v1230_v61 }
 0x720   : > { %v1357_v39 = vsub.f32 %v1350_v34, %v1356_v38 }
 0x722   : > { %v1358_v40 = vmul.f32 %v1357_v39, %v1357_v39 }
 0x724   : > { %v1359_v41 = vsel %vm849_vm1, %v1358_v40, 0.0 }
 0x725   : > { %1360 = vadd.xlane.f32.xlu1 %v1359_v41 }
 0x798   : > { %v1361_v42 = vpop.xlane.xlu1 %1360 }
 0x799   : > { %v1362_v43 = vmul.f32 %v1361_v42, %v1230_v61 }
 0x79b   : > { %v1363_v44 = vadd.f32 1e-05, %v1362_v43 }
 0x79d   : > { %1815 = vrsqrt.f32 %v1363_v44  ;;  %vm1370_vm12 = vweird.f32 %v1363_v44 }
 0x7a3   : > { %v1816_v45 = vpop.eup %1815 }
 0x7a4   : > { %v1365_v46 = vmul.f32 %v1816_v45, %v1363_v44  ;;  %vm1371_vm11 = vweird.f32 %v1816_v45 }
 0x7a5   : > { %vm1372_vm13 = vmor %vm1370_vm12, %vm1371_vm11 }
 0x7a6   : > { %v1366_v47 = vmul.f32 %v1816_v45, %v1365_v46 }
 0x7a8   : > { %v1367_v48 = vmul.f32 0.5, %v1366_v47 }
 0x7aa   : > { %v1368_v49 = vsub.f32 1.5, %v1367_v48 }
 0x7ac   : > { %v1369_v50 = vmul.f32 %v1816_v45, %v1368_v49 }
 0x7ae   : > { %v1373_v52 = vsel %vm1372_vm13, %v1816_v45, %v1369_v50 }
 0x7af   : > { %v1374_v54 = vmul.f32 %v1373_v52, %v1357_v39 }
 0x7b1   : > { %v1378_v55 = vmul.f32 %v1793_v51, %v1374_v54  ;;  %1387 = sbr.rel (%p1700_p11) target bundleno = 1975 (0x7b7), region = 104 }
 0x7b3   : > { %v1382_v56 = vadd.f32 %v1794_v53, %v1378_v55 }
 0x7b5   : > { %1383 = vst.msk [vmem:[#allocation2] sm:$0xff] %vm849_vm1, %v1382_v56 }
 0x7b6   : > { %1388 = vst.msk [vmem:[#allocation8] sm:$0xff] %vm849_vm1, %v1382_v56 }
 0x7b7 PF: > { %p1741_p2 = scmp.eq.s32.totalorder %s2068_s28, 1  ;;  %s1958_s10 = smov [#allocation8]  }
 0x7b8   : > { %s1395_s20 = sshll.u32 %s1958_s10, 4  ;;  %s2437_s15 = sld [smem:[#allocation30_spill]]  ;;  %s1396_s20 = int_to_ptr.vmem [resolvable:$true] %s1395_s20 }
 0x7be   : > { %s1397_s13 = sshll.u32 %s2437_s15, 4  ;;  %s1398_s13 = int_to_ptr.hbm [resolvable:$true] %s1397_s13 }
 0x7bf   : > { %1730 = dma.vmem_to_hbm [thread:$0]  (%p1741_p2), %s1396_s20, 128, %s1398_s13, [#allocation5]  }
 0x7c0   : > { %1930 = dma.done.wait (%p1741_p2), [#allocation5], 128  }
 0x7c1   : > { %1932 = vsyncadd (%p1741_p2), [#allocation5], 4294967168 }
 0x7c2 PF: > { %s2438_s27 = sld [smem:[#allocation14_spill]] }
 0x7c3   : > { %s2439_s24 = sld [smem:[#allocation12_spill]] }
 0x7c4   : > { %s2440_s25 = sld [smem:[#allocation13_spill]] }
 0x7c5   : > { %s2441_s26 = sld [smem:[#allocation15_spill]] }
 0x7c8   : > { %p31_p3 = scmp.ge.s32.totalorder %s2438_s27, 4  }
 0x7ca   :  { %33 = sbr.rel (!%p31_p3) target bundleno = 21 (0x15), region = 188 }
 0x7cf   :  { %1411 = vsyncpa [#allocation4], 1 }
 0x7d0   :  { %1413 = vsyncpa [#allocation4 + $0x1], 1 }
 0x7d1   :  { %1414 = vsyncpa [#allocation7], 1 }
 0x7d2   :  { %1416 = vsyncpa [#allocation7 + $0x1], 1 }
 0x7d3   :  { %1417 = vsyncpa [#allocation5], 1 }
 0x7d4   :  { %1419 = vsyncpa [#allocation5 + $0x1], 1 }

</bundles_post_ra>
